<compile_context>
chip_gen: v6e
topology: v6e:2x2x1
jax: 0.10.0
libtpu: 0.0.40
codegen_flags: <defaults>
</compile_context>

<pallas_src>
import jax
import jax.numpy as jnp
from jax.experimental import pallas as pl
from jax.experimental.pallas import tpu as pltpu

LANE = 128  # TPU lane width: all feature dims are padded to this.


def _round_up(x, m):
    return ((x + m - 1) // m) * m


def reinforce_mlp_kernel(x_ref,
                         w1_ref, b1_ref,
                         w2_ref, b2_ref,
                         w3_ref, b3_ref,
                         w4_ref, b4_ref,
                         w5_ref, b5_ref,
                         out_ref):
    """Fused 5-layer MLP forward on one (TILE_B, 128) activation tile."""

    def layer(h, w_ref, b_ref, relu):
        y = jnp.dot(h, w_ref[...], preferred_element_type=jnp.float32)
        y = y + b_ref[...]                      # f32 bias add (v5e-safe)
        if relu:
            y = jnp.maximum(y, 0.0).astype(jnp.bfloat16)  # re-quantize for next MXU pass
        return y

    h = x_ref[...]                              # (TILE_B, 128) bf16
    h = layer(h, w1_ref, b1_ref, True)
    h = layer(h, w2_ref, b2_ref, True)
    h = layer(h, w3_ref, b3_ref, True)
    h = layer(h, w4_ref, b4_ref, True)
    y = layer(h, w5_ref, b5_ref, False)         # f32 logits, lane-dense 128-wide slab
    out_ref[...] = y.astype(out_ref.dtype)
    # TODO(synk): optionally fuse log-softmax over the first n_actions lanes here
    # (EUP slot is idle) if the RL loss wants log-probs instead of raw logits.


def init_params(key, n_features, n_actions, hidden=64):
    """Deterministic PyTorch-style (uniform +/- 1/sqrt(fan_in)) init, f32, (in,out) layout."""
    dims = [n_features, hidden, hidden, hidden, hidden, n_actions]
    params = []
    for i in range(len(dims) - 1):
        fan_in, fan_out = dims[i], dims[i + 1]
        key, kw, kb = jax.random.split(key, 3)
        bound = 1.0 / jnp.sqrt(jnp.float32(fan_in))
        w = jax.random.uniform(kw, (fan_in, fan_out), jnp.float32, -bound, bound)
        b = jax.random.uniform(kb, (1, fan_out), jnp.float32, -bound, bound)
        params.append((w, b))
    return params


def pack_params(params):
    """Zero-pad every weight/bias to 128 lanes; weights -> bf16, biases stay f32."""
    packed = []
    for (w, b) in params:
        fi, fo = w.shape
        fi_p, fo_p = _round_up(fi, LANE), _round_up(fo, LANE)
        wp = jnp.zeros((fi_p, fo_p), jnp.float32).at[:fi, :fo].set(w)
        bp = jnp.zeros((1, fo_p), jnp.float32).at[:, :fo].set(b)
        packed.append((wp.astype(jnp.bfloat16), bp))
    return packed


def reinforce_forward(x, packed_params, n_actions, *, tile_b=None):
    """Fused policy-net forward.

    x:             (batch, n_features) float32
    packed_params: output of pack_params()
    returns        (batch, n_actions) float32 logits
    """
    batch, n_feat = x.shape
    f_pad = packed_params[0][0].shape[0]
    out_pad = packed_params[-1][0].shape[1]

    if tile_b is None:
        # 512 is the v6e/v7x sweet spot (>=256 MXU tile, amortizes per-step overhead);
        # for tiny batches just use one 8-row-aligned tile.
        tile_b = min(512, _round_up(batch, 8))
    tile_b = max(8, tile_b)
    b_pad = _round_up(batch, tile_b)

    # Zero-pad batch rows + feature lanes; cast activations to bf16 (halves DMA bytes).
    x_pad = jnp.zeros((b_pad, f_pad), jnp.float32).at[:batch, :n_feat].set(x)
    x_pad = x_pad.astype(jnp.bfloat16)

    grid = (b_pad // tile_b,)

    flat_args = [x_pad]
    in_specs = [pl.BlockSpec((tile_b, f_pad), lambda i: (i, 0))]
    for (w, b) in packed_params:
        flat_args.extend([w, b])
        in_specs.append(pl.BlockSpec(w.shape, lambda i: (0, 0)))  # VMEM-resident weights
        in_specs.append(pl.BlockSpec(b.shape, lambda i: (0, 0)))  # VMEM-resident biases

    out_full = pl.pallas_call(
        reinforce_mlp_kernel,
        out_shape=jax.ShapeDtypeStruct((b_pad, out_pad), jnp.float32),
        grid=grid,
        in_specs=in_specs,
        out_specs=pl.BlockSpec((tile_b, out_pad), lambda i: (i, 0)),
        compiler_params=pltpu.CompilerParams(
            dimension_semantics=("parallel",),  # v7x: split batch across the 2 TCs
        ),
    )(*flat_args)

    return out_full[:batch, :n_actions]


# ----------------------------- references -----------------------------------

def reference_forward_f32(x, params):
    """Pure f32 reference matching the PyTorch module exactly."""
    h = x
    for i, (w, b) in enumerate(params):
        h = h @ w + b
        if i < len(params) - 1:
            h = jnp.maximum(h, 0.0)
    return h


def reference_forward_bf16(x, packed_params, n_actions, n_features):
    """Plain-jnp reference with the kernel's exact compute structure (bf16 in, f32 acc)."""
    f_pad = packed_params[0][0].shape[0]
    h = jnp.zeros((x.shape[0], f_pad), jnp.float32).at[:, :n_features].set(x)
    h = h.astype(jnp.bfloat16)
    for i, (w, b) in enumerate(packed_params):
        h = jnp.dot(h, w, preferred_element_type=jnp.float32) + b
        if i < len(packed_params) - 1:
            h = jnp.maximum(h, 0.0).astype(jnp.bfloat16)
    return h[:, :n_actions]


if __name__ == "__main__":
    n_features = 8
    n_actions = 4

    key = jax.random.PRNGKey(0)
    kx, kx2, kp = jax.random.split(key, 3)
    params = init_params(kp, n_features, n_actions)
    packed = pack_params(params)

    # --- small, module-shaped case (batch=2) --------------------------------
    x = jax.random.normal(kx, (2, n_features), jnp.float32)
    logits = reinforce_forward(x, packed, n_actions)
    jax.block_until_ready(logits)
    assert logits.shape == (2, n_actions)

    ref_bf16 = reference_forward_bf16(x, packed, n_actions, n_features)
    ref_f32 = reference_forward_f32(x, params)
    assert jnp.allclose(logits, ref_bf16, atol=1e-3, rtol=1e-3), "mismatch vs bf16 reference"
    assert jnp.allclose(logits, ref_f32, atol=5e-2, rtol=5e-2), "mismatch vs f32 reference"

    # --- multi-tile case: exercises the batch grid, padding & weight residency
    xb = jax.random.normal(kx2, (300, n_features), jnp.float32)
    logits_b = reinforce_forward(xb, packed, n_actions, tile_b=128)
    jax.block_until_ready(logits_b)
    assert logits_b.shape == (300, n_actions)
    ref_b = reference_forward_bf16(xb, packed, n_actions, n_features)
    assert jnp.allclose(logits_b, ref_b, atol=1e-3, rtol=1e-3), "mismatch (tiled) vs reference"

    print("KERNEL_OK")
</pallas_src>

<mosaic_0001>
module attributes {stable_mosaic.version = 11 : i64} {
  func.func @reinforce_mlp_kernel(%arg0: i32, %arg1: memref<8x128xbf16, #tpu.memory_space<vmem>>, %arg2: memref<128x128xbf16, #tpu.memory_space<vmem>>, %arg3: memref<1x128xf32, #tpu.memory_space<vmem>>, %arg4: memref<128x128xbf16, #tpu.memory_space<vmem>>, %arg5: memref<1x128xf32, #tpu.memory_space<vmem>>, %arg6: memref<128x128xbf16, #tpu.memory_space<vmem>>, %arg7: memref<1x128xf32, #tpu.memory_space<vmem>>, %arg8: memref<128x128xbf16, #tpu.memory_space<vmem>>, %arg9: memref<1x128xf32, #tpu.memory_space<vmem>>, %arg10: memref<128x128xbf16, #tpu.memory_space<vmem>>, %arg11: memref<1x128xf32, #tpu.memory_space<vmem>>, %arg12: memref<8x128xf32, #tpu.memory_space<vmem>>) attributes {dimension_semantics = [#tpu.dimension_semantics<parallel>], iteration_bounds = array<i64: 1>, scalar_prefetch = 0 : i64, scratch_operands = 0 : i64, tpu.core_type = #tpu.core_type<tc>, window_params = [{transform_indices = @transform_0, window_bounds = array<i64: 8, 128>}, {pipeline_mode = #tpu.pipeline_mode<synchronous>, transform_indices = @transform_1, window_bounds = array<i64: 128, 128>}, {pipeline_mode = #tpu.pipeline_mode<synchronous>, transform_indices = @transform_2, window_bounds = array<i64: 1, 128>}, {pipeline_mode = #tpu.pipeline_mode<synchronous>, transform_indices = @transform_3, window_bounds = array<i64: 128, 128>}, {pipeline_mode = #tpu.pipeline_mode<synchronous>, transform_indices = @transform_4, window_bounds = array<i64: 1, 128>}, {pipeline_mode = #tpu.pipeline_mode<synchronous>, transform_indices = @transform_5, window_bounds = array<i64: 128, 128>}, {pipeline_mode = #tpu.pipeline_mode<synchronous>, transform_indices = @transform_6, window_bounds = array<i64: 1, 128>}, {pipeline_mode = #tpu.pipeline_mode<synchronous>, transform_indices = @transform_7, window_bounds = array<i64: 128, 128>}, {pipeline_mode = #tpu.pipeline_mode<synchronous>, transform_indices = @transform_8, window_bounds = array<i64: 1, 128>}, {pipeline_mode = #tpu.pipeline_mode<synchronous>, transform_indices = @transform_9, window_bounds = array<i64: 128, 128>}, {pipeline_mode = #tpu.pipeline_mode<synchronous>, transform_indices = @transform_10, window_bounds = array<i64: 1, 128>}, {transform_indices = @transform_11, window_bounds = array<i64: 8, 128>}]} {
    %c0 = arith.constant 0 : index
    %c0_0 = arith.constant 0 : index
    %0 = vector.load %arg1[%c0, %c0_0] : memref<8x128xbf16, #tpu.memory_space<vmem>>, vector<8x128xbf16>
    %c0_1 = arith.constant 0 : index
    %c0_2 = arith.constant 0 : index
    %1 = vector.load %arg2[%c0_1, %c0_2] : memref<128x128xbf16, #tpu.memory_space<vmem>>, vector<128x128xbf16>
    %cst = arith.constant dense<0.000000e+00> : vector<8x128xf32>
    %2 = tpu.matmul %0, %1, %cst {dimension_numbers = #tpu.dot_dimension_numbers<[1], [0], [0], [1], [0, 0, 1, 1], [], []>} : vector<8x128xbf16>, vector<128x128xbf16>, vector<8x128xf32> -> vector<8x128xf32>
    %c0_3 = arith.constant 0 : index
    %c0_4 = arith.constant 0 : index
    %3 = vector.load %arg3[%c0_3, %c0_4] : memref<1x128xf32, #tpu.memory_space<vmem>>, vector<1x128xf32>
    %4 = vector.broadcast %3 : vector<1x128xf32> to vector<8x128xf32>
    %5 = arith.addf %2, %4 : vector<8x128xf32>
    %cst_5 = arith.constant 0.000000e+00 : f32
    %6 = vector.broadcast %cst_5 : f32 to vector<8x128xf32>
    %7 = arith.maximumf %5, %6 : vector<8x128xf32>
    %8 = arith.truncf %7 : vector<8x128xf32> to vector<8x128xbf16>
    %c0_6 = arith.constant 0 : index
    %c0_7 = arith.constant 0 : index
    %9 = vector.load %arg4[%c0_6, %c0_7] : memref<128x128xbf16, #tpu.memory_space<vmem>>, vector<128x128xbf16>
    %cst_8 = arith.constant dense<0.000000e+00> : vector<8x128xf32>
    %10 = tpu.matmul %8, %9, %cst_8 {dimension_numbers = #tpu.dot_dimension_numbers<[1], [0], [0], [1], [0, 0, 1, 1], [], []>} : vector<8x128xbf16>, vector<128x128xbf16>, vector<8x128xf32> -> vector<8x128xf32>
    %c0_9 = arith.constant 0 : index
    %c0_10 = arith.constant 0 : index
    %11 = vector.load %arg5[%c0_9, %c0_10] : memref<1x128xf32, #tpu.memory_space<vmem>>, vector<1x128xf32>
    %12 = vector.broadcast %11 : vector<1x128xf32> to vector<8x128xf32>
    %13 = arith.addf %10, %12 : vector<8x128xf32>
    %cst_11 = arith.constant 0.000000e+00 : f32
    %14 = vector.broadcast %cst_11 : f32 to vector<8x128xf32>
    %15 = arith.maximumf %13, %14 : vector<8x128xf32>
    %16 = arith.truncf %15 : vector<8x128xf32> to vector<8x128xbf16>
    %c0_12 = arith.constant 0 : index
    %c0_13 = arith.constant 0 : index
    %17 = vector.load %arg6[%c0_12, %c0_13] : memref<128x128xbf16, #tpu.memory_space<vmem>>, vector<128x128xbf16>
    %cst_14 = arith.constant dense<0.000000e+00> : vector<8x128xf32>
    %18 = tpu.matmul %16, %17, %cst_14 {dimension_numbers = #tpu.dot_dimension_numbers<[1], [0], [0], [1], [0, 0, 1, 1], [], []>} : vector<8x128xbf16>, vector<128x128xbf16>, vector<8x128xf32> -> vector<8x128xf32>
    %c0_15 = arith.constant 0 : index
    %c0_16 = arith.constant 0 : index
    %19 = vector.load %arg7[%c0_15, %c0_16] : memref<1x128xf32, #tpu.memory_space<vmem>>, vector<1x128xf32>
    %20 = vector.broadcast %19 : vector<1x128xf32> to vector<8x128xf32>
    %21 = arith.addf %18, %20 : vector<8x128xf32>
    %cst_17 = arith.constant 0.000000e+00 : f32
    %22 = vector.broadcast %cst_17 : f32 to vector<8x128xf32>
    %23 = arith.maximumf %21, %22 : vector<8x128xf32>
    %24 = arith.truncf %23 : vector<8x128xf32> to vector<8x128xbf16>
    %c0_18 = arith.constant 0 : index
    %c0_19 = arith.constant 0 : index
    %25 = vector.load %arg8[%c0_18, %c0_19] : memref<128x128xbf16, #tpu.memory_space<vmem>>, vector<128x128xbf16>
    %cst_20 = arith.constant dense<0.000000e+00> : vector<8x128xf32>
    %26 = tpu.matmul %24, %25, %cst_20 {dimension_numbers = #tpu.dot_dimension_numbers<[1], [0], [0], [1], [0, 0, 1, 1], [], []>} : vector<8x128xbf16>, vector<128x128xbf16>, vector<8x128xf32> -> vector<8x128xf32>
    %c0_21 = arith.constant 0 : index
    %c0_22 = arith.constant 0 : index
    %27 = vector.load %arg9[%c0_21, %c0_22] : memref<1x128xf32, #tpu.memory_space<vmem>>, vector<1x128xf32>
    %28 = vector.broadcast %27 : vector<1x128xf32> to vector<8x128xf32>
    %29 = arith.addf %26, %28 : vector<8x128xf32>
    %cst_23 = arith.constant 0.000000e+00 : f32
    %30 = vector.broadcast %cst_23 : f32 to vector<8x128xf32>
    %31 = arith.maximumf %29, %30 : vector<8x128xf32>
    %32 = arith.truncf %31 : vector<8x128xf32> to vector<8x128xbf16>
    %c0_24 = arith.constant 0 : index
    %c0_25 = arith.constant 0 : index
    %33 = vector.load %arg10[%c0_24, %c0_25] : memref<128x128xbf16, #tpu.memory_space<vmem>>, vector<128x128xbf16>
    %cst_26 = arith.constant dense<0.000000e+00> : vector<8x128xf32>
    %34 = tpu.matmul %32, %33, %cst_26 {dimension_numbers = #tpu.dot_dimension_numbers<[1], [0], [0], [1], [0, 0, 1, 1], [], []>} : vector<8x128xbf16>, vector<128x128xbf16>, vector<8x128xf32> -> vector<8x128xf32>
    %c0_27 = arith.constant 0 : index
    %c0_28 = arith.constant 0 : index
    %35 = vector.load %arg11[%c0_27, %c0_28] : memref<1x128xf32, #tpu.memory_space<vmem>>, vector<1x128xf32>
    %36 = vector.broadcast %35 : vector<1x128xf32> to vector<8x128xf32>
    %37 = arith.addf %34, %36 : vector<8x128xf32>
    %c0_29 = arith.constant 0 : index
    %c0_30 = arith.constant 0 : index
    %38 = vector.load %arg12[%c0_29, %c0_30] : memref<8x128xf32, #tpu.memory_space<vmem>>, vector<8x128xf32>
    tpu.vector_store %arg12[%c0_29, %c0_30], %37 {strides = array<i32>} : memref<8x128xf32, #tpu.memory_space<vmem>>, vector<8x128xf32>,
    return
  }
  func.func @transform_0(%arg0: i32) -> (i32, i32) {
    %c0_i32 = arith.constant 0 : i32
    %c0_i32_0 = arith.constant 0 : i32
    return %arg0, %c0_i32 : i32, i32
  }
  func.func @transform_1(%arg0: i32) -> (i32, i32) {
    %c0_i32 = arith.constant 0 : i32
    %c0_i32_0 = arith.constant 0 : i32
    %c0_i32_1 = arith.constant 0 : i32
    return %c0_i32, %c0_i32_0 : i32, i32
  }
  func.func @transform_2(%arg0: i32) -> (i32, i32) {
    %c0_i32 = arith.constant 0 : i32
    %c0_i32_0 = arith.constant 0 : i32
    %c0_i32_1 = arith.constant 0 : i32
    return %c0_i32, %c0_i32_0 : i32, i32
  }
  func.func @transform_3(%arg0: i32) -> (i32, i32) {
    %c0_i32 = arith.constant 0 : i32
    %c0_i32_0 = arith.constant 0 : i32
    %c0_i32_1 = arith.constant 0 : i32
    return %c0_i32, %c0_i32_0 : i32, i32
  }
  func.func @transform_4(%arg0: i32) -> (i32, i32) {
    %c0_i32 = arith.constant 0 : i32
    %c0_i32_0 = arith.constant 0 : i32
    %c0_i32_1 = arith.constant 0 : i32
    return %c0_i32, %c0_i32_0 : i32, i32
  }
  func.func @transform_5(%arg0: i32) -> (i32, i32) {
    %c0_i32 = arith.constant 0 : i32
    %c0_i32_0 = arith.constant 0 : i32
    %c0_i32_1 = arith.constant 0 : i32
    return %c0_i32, %c0_i32_0 : i32, i32
  }
  func.func @transform_6(%arg0: i32) -> (i32, i32) {
    %c0_i32 = arith.constant 0 : i32
    %c0_i32_0 = arith.constant 0 : i32
    %c0_i32_1 = arith.constant 0 : i32
    return %c0_i32, %c0_i32_0 : i32, i32
  }
  func.func @transform_7(%arg0: i32) -> (i32, i32) {
    %c0_i32 = arith.constant 0 : i32
    %c0_i32_0 = arith.constant 0 : i32
    %c0_i32_1 = arith.constant 0 : i32
    return %c0_i32, %c0_i32_0 : i32, i32
  }
  func.func @transform_8(%arg0: i32) -> (i32, i32) {
    %c0_i32 = arith.constant 0 : i32
    %c0_i32_0 = arith.constant 0 : i32
    %c0_i32_1 = arith.constant 0 : i32
    return %c0_i32, %c0_i32_0 : i32, i32
  }
  func.func @transform_9(%arg0: i32) -> (i32, i32) {
    %c0_i32 = arith.constant 0 : i32
    %c0_i32_0 = arith.constant 0 : i32
    %c0_i32_1 = arith.constant 0 : i32
    return %c0_i32, %c0_i32_0 : i32, i32
  }
  func.func @transform_10(%arg0: i32) -> (i32, i32) {
    %c0_i32 = arith.constant 0 : i32
    %c0_i32_0 = arith.constant 0 : i32
    %c0_i32_1 = arith.constant 0 : i32
    return %c0_i32, %c0_i32_0 : i32, i32
  }
  func.func @transform_11(%arg0: i32) -> (i32, i32) {
    %c0_i32 = arith.constant 0 : i32
    %c0_i32_0 = arith.constant 0 : i32
    return %arg0, %c0_i32 : i32, i32
  }
}

</mosaic_0001>

<bundles_post_ra>
// kernel: tpu_custom_call.1
= control target key start
LH: loop header
LB: loop body
LE: loop exit
PB: predicated region body
PF: predicated region fallthrough
CT: control target
= control target key end

     0   :  { %16 = vsyncpa [#allocation3], 0  ;;  %s1266_s0 = inlined_call_operand.hbm [shape: bf16[8,128], index: 0, kind: input, shape index: {}]   ;;  %s1267_s1 = inlined_call_operand.hbm [shape: bf16[128,128], index: 1, kind: input, shape index: {}]   ;;  %s1268_s2 = inlined_call_operand.vmem [shape: f32[1,128], index: 2, kind: input, shape index: {}]   ;;  %s1269_s3 = inlined_call_operand.hbm [shape: bf16[128,128], index: 3, kind: input, shape index: {}]   ;;  %s1270_s4 = inlined_call_operand.vmem [shape: f32[1,128], index: 4, kind: input, shape index: {}]   ;;  %s1271_s5 = inlined_call_operand.hbm [shape: bf16[128,128], index: 5, kind: input, shape index: {}]   ;;  %s1272_s6 = inlined_call_operand.vmem [shape: f32[1,128], index: 6, kind: input, shape index: {}]   ;;  %s1273_s7 = inlined_call_operand.hbm [shape: bf16[128,128], index: 7, kind: input, shape index: {}]   ;;  %s1274_s8 = inlined_call_operand.vmem [shape: f32[1,128], index: 8, kind: input, shape index: {}]   ;;  %s1275_s9 = inlined_call_operand.hbm [shape: bf16[128,128], index: 9, kind: input, shape index: {}]   ;;  %s1276_s10 = inlined_call_operand.vmem [shape: f32[1,128], index: 10, kind: input, shape index: {}]   ;;  %s1277_s11 = inlined_call_operand.hbm [shape: f32[8,128], index: 11, kind: output, shape index: {}]  }
   0x1   :  { %17 = vsyncpa [#allocation6], 0 }
   0x2   :  { %18 = vsyncpa [#allocation9], 0 }
   0x3   :  { %19 = vsyncpa [#allocation12], 0 }
   0x4   :  { %20 = vsyncpa [#allocation4], 0  ;;  %s1094_s17 = smov [#allocation5]  }
   0x5   :  { %s36_s18 = sshll.u32 %s1094_s17, 4  ;;  %s37_s18 = int_to_ptr.vmem [resolvable:$true] %s36_s18 }
   0x6   :  { %s952_s19 = scalar_lea.vmem %s37_s18, 1024  ;;  %p957_p1 = scmp.lt.s32.totalorder %s37_s18, %s37_s18 }
   0x7   :  { %p953_p0 = scmp.ne.s32.totalorder %s37_s18, %s952_s19  ;;  %p958_p2 = scmp.lt.s32.totalorder %s952_s19, %s952_s19 }
   0x9   :  { %p959_p3 = por %p958_p2, %p957_p1 }
   0xb   :  { %p960_p4 = pnand %p959_p3, %p953_p0 }
   0xd   :  { %963 = shalt.err (!%p960_p4)
}
   0xe   :  { %s1095_s20 = smov 64   ;;  %s1096_s21 = smov 4  }
   0xf   :  { %42 = dma.hbm_to_vmem [thread:$0]  %s1267_s1, 1024, %s37_s18, [#allocation6], %s1095_s20, %s1095_s20, %s1096_s21  }
  0x10   :  { %s1097_s24 = smov [#allocation8]   ;;  %s1098_s26 = smov [#allocation2]  }
  0x11   :  { %s64_s25 = sshll.u32 %s1097_s24, 4  ;;  %s27_s27 = sshll.u32 %s1098_s26, 4  ;;  %s65_s25 = int_to_ptr.vmem [resolvable:$true] %s64_s25  ;;  %s28_s27 = int_to_ptr.vmem [resolvable:$true] %s27_s27 }
  0x12   :  { %s972_s28 = scalar_lea.vmem %s65_s25, 1024  ;;  %p977_p6 = scmp.lt.s32.totalorder %s65_s25, %s65_s25 }
  0x13   :  { %p973_p5 = scmp.ne.s32.totalorder %s65_s25, %s972_s28  ;;  %p978_p7 = scmp.lt.s32.totalorder %s972_s28, %s972_s28 }
  0x15   :  { %p979_p8 = por %p978_p7, %p977_p6 }
  0x17   :  { %p980_p9 = pnand %p979_p8, %p973_p5 }
  0x19   :  { %983 = shalt.err (!%p980_p9)
}
  0x1a   :  { %70 = dma.hbm_to_vmem [thread:$0]  %s1271_s5, 1024, %s65_s25, [#allocation9], %s1095_s20, %s1095_s20, %s1096_s21  }
  0x1b   :  { %s992_s1 = scalar_lea.vmem %s28_s27, 64  ;;  %p997_p11 = scmp.lt.s32.totalorder %s28_s27, %s28_s27 }
  0x1c   :  { %p993_p10 = scmp.ne.s32.totalorder %s28_s27, %s992_s1  ;;  %p998_p12 = scmp.lt.s32.totalorder %s992_s1, %s992_s1 }
  0x1e   :  { %p999_p13 = por %p998_p12, %p997_p11 }
  0x20   :  { %p1000_p0 = pnand %p999_p13, %p993_p10 }
  0x22   :  { %1003 = shalt.err (!%p1000_p0)
}
  0x23   :  { %30 = dma.hbm_to_vmem [thread:$0]  %s1266_s0, 64, %s28_s27, [#allocation3]  }
  0x24   :  { %s1099_s14 = smov [#allocation7]   ;;  %s1100_s16 = smov [#allocation10]  }
  0x25   :  { %s50_s15 = sshll.u32 %s1099_s14, 4  ;;  %s78_s17 = sshll.u32 %s1100_s16, 4  ;;  %s51_s15 = int_to_ptr.vmem [resolvable:$true] %s50_s15  ;;  %s79_s17 = int_to_ptr.vmem [resolvable:$true] %s78_s17 }
  0x26   :  { %s1012_s18 = scalar_lea.vmem %s51_s15, 1024  ;;  %p1017_p2 = scmp.lt.s32.totalorder %s51_s15, %s51_s15 }
  0x27   :  { %p1013_p1 = scmp.ne.s32.totalorder %s51_s15, %s1012_s18  ;;  %p1018_p3 = scmp.lt.s32.totalorder %s1012_s18, %s1012_s18 }
  0x29   :  { %p1019_p4 = por %p1018_p3, %p1017_p2 }
  0x2b   :  { %p1020_p5 = pnand %p1019_p4, %p1013_p1 }
  0x2d   :  { %1023 = shalt.err (!%p1020_p5)
}
  0x2e   :  { %56 = dma.hbm_to_vmem [thread:$0]  %s1269_s3, 1024, %s51_s15, [#allocation6], %s1095_s20, %s1095_s20, %s1096_s21  }
  0x2f   :  { %s1032_s0 = scalar_lea.vmem %s79_s17, 1024  ;;  %p1037_p7 = scmp.lt.s32.totalorder %s79_s17, %s79_s17 }
  0x30   :  { %p1033_p6 = scmp.ne.s32.totalorder %s79_s17, %s1032_s0  ;;  %p1038_p8 = scmp.lt.s32.totalorder %s1032_s0, %s1032_s0 }
  0x32   :  { %p1039_p9 = por %p1038_p8, %p1037_p7 }
  0x34   :  { %p1040_p10 = pnand %p1039_p9, %p1033_p6 }
  0x36   :  { %1043 = shalt.err (!%p1040_p10)
}
  0x37   :  { %84 = dma.hbm_to_vmem [thread:$0]  %s1273_s7, 1024, %s79_s17, [#allocation9], %s1095_s20, %s1095_s20, %s1096_s21  }
  0x38   :  { %s1101_s24 = smov [#allocation11]  }
  0x39   :  { %s92_s25 = sshll.u32 %s1101_s24, 4  ;;  %s93_s25 = int_to_ptr.vmem [resolvable:$true] %s92_s25 }
  0x3a   :  { %s1052_s26 = scalar_lea.vmem %s93_s25, 1024  ;;  %p1057_p12 = scmp.lt.s32.totalorder %s93_s25, %s93_s25 }
  0x3b   :  { %p1053_p11 = scmp.ne.s32.totalorder %s93_s25, %s1052_s26  ;;  %p1058_p13 = scmp.lt.s32.totalorder %s1052_s26, %s1052_s26 }
  0x3d   :  { %p1059_p0 = por %p1058_p13, %p1057_p12 }
  0x3f   :  { %p1060_p1 = pnand %p1059_p0, %p1053_p11 }
  0x41   :  { %1063 = shalt.err (!%p1060_p1)
}
  0x42   :  { %98 = dma.hbm_to_vmem [thread:$0]  %s1275_s9, 1024, %s93_s25, [#allocation12], %s1095_s20, %s1095_s20, %s1096_s21  }
  0x43   :  { %1084 = dma.done.wait [#allocation3], 64  }
  0x44   :  { %1085 = vsyncadd [#allocation3], 4294967232 }
  0x45   :  { %1086 = dma.done.wait [#allocation6], 2048  }
  0x46   :  { %1087 = vsyncadd [#allocation6], 4294965248 }
  0x47   :  { %1088 = dma.done.wait [#allocation9], 2048  }
  0x48   :  { %1089 = vsyncadd [#allocation9], 4294965248 }
  0x49   :  { %1090 = dma.done.wait [#allocation12], 1024  }
  0x4a   :  { %1091 = vsyncadd [#allocation12], 4294966272  ;;  %v1102_v0 = vmov 0.0   ;;  %vm1103_vm0 = vmmov 0   ;;  %v904_v1 = vld [vmem:[#allocation5 + $0x38] sm:$0xff]   ;;  %v905_v2 = vld [vmem:[#allocation5 + $0x30] sm:$0xff]  }
  0x4b   :  { %793 = vmatprep.subr.bf16.mxu0 %v1102_v0  ;;  %809 = vmatprep.mubr.msk.bf16.mxu0 %vm1103_vm0, %v1102_v0  ;;  %v906_v3 = vld [vmem:[#allocation5 + $0x28] sm:$0xff]   ;;  %v912_v4 = vld [vmem:[#allocation7 + $0x38] sm:$0xff]   ;;  %v907_v5 = vld [vmem:[#allocation5 + $0x20] sm:$0xff]   ;;  %s1104_s1 = smov [#allocation13]  }
  0x4c   :  { %813 = vmatprep.subr.bf16.mxu1 %v1102_v0  ;;  %829 = vmatprep.mubr.msk.bf16.mxu1 %vm1103_vm0, %v1102_v0  ;;  %v913_v6 = vld [vmem:[#allocation7 + $0x30] sm:$0xff]   ;;  %v908_v7 = vld [vmem:[#allocation5 + $0x18] sm:$0xff]   ;;  %v914_v8 = vld [vmem:[#allocation7 + $0x28] sm:$0xff]   ;;  %s691_s12 = sshll.u32 %s1104_s1, 4  ;;  %s692_s12 = int_to_ptr.vmem [resolvable:$true] %s691_s12 }
  0x4d   :  { %794 = vmatpush3.bf16.msra.mxu0 %v904_v1  ;;  %814 = vmatpush3.bf16.msra.mxu1 %v912_v4  ;;  %v909_v9 = vld [vmem:[#allocation5 + $0x10] sm:$0xff]   ;;  %v915_v10 = vld [vmem:[#allocation7 + $0x20] sm:$0xff]   ;;  %v910_v11 = vld [vmem:[#allocation5 + $0x8] sm:$0xff]   ;;  %p1069_p3 = scmp.lt.s32.totalorder %s692_s12, %s692_s12 }
  0x4e   :  { %795 = vmatprep.subr.bf16.mxu0 %v1102_v0  ;;  %815 = vmatprep.subr.bf16.mxu1 %v1102_v0  ;;  %v916_v12 = vld [vmem:[#allocation7 + $0x18] sm:$0xff]   ;;  %v911_v13 = vld [vmem:[#allocation5] sm:$0xff]   ;;  %v917_v14 = vld [vmem:[#allocation7 + $0x10] sm:$0xff]  }
  0x4f   :  { %v120_v15 = vld [vmem:[#allocation2] sm:$0xf]  ;;  %v918_v16 = vld [vmem:[#allocation7 + $0x8] sm:$0xff]   ;;  %v919_v17 = vld [vmem:[#allocation7] sm:$0xff]  }
  0x50   :  { %v920_v18 = vld [vmem:[#allocation8 + $0x38] sm:$0xff]   ;;  %v921_v19 = vld [vmem:[#allocation8 + $0x30] sm:$0xff]   ;;  %v922_v20 = vld [vmem:[#allocation8 + $0x28] sm:$0xff]  }
  0x51   :  { %796 = vmatpush3.bf16.msra.mxu0 %v905_v2  ;;  %816 = vmatpush3.bf16.msra.mxu1 %v913_v6  ;;  %v923_v21 = vld [vmem:[#allocation8 + $0x20] sm:$0xff]   ;;  %v924_v22 = vld [vmem:[#allocation8 + $0x18] sm:$0xff]   ;;  %v925_v23 = vld [vmem:[#allocation8 + $0x10] sm:$0xff]  }
  0x52   :  { %797 = vmatprep.subr.bf16.mxu0 %v1102_v0  ;;  %817 = vmatprep.subr.bf16.mxu1 %v1102_v0  ;;  %v703_v24 = vld [vmem:[%s1268_s2] ss:$0 sm:$0xff]  ;;  %v926_v32 = vld [vmem:[#allocation8 + $0x8] sm:$0xff]   ;;  %v927_v33 = vld [vmem:[#allocation8] sm:$0xff]  }
  0x53   :  { %v928_v34 = vld [vmem:[#allocation10 + $0x38] sm:$0xff]   ;;  %v929_v35 = vld [vmem:[#allocation10 + $0x30] sm:$0xff]   ;;  %v930_v36 = vld [vmem:[#allocation10 + $0x28] sm:$0xff]  }
  0x54   :  { %v931_v37 = vld [vmem:[#allocation10 + $0x20] sm:$0xff]   ;;  %v932_v38 = vld [vmem:[#allocation10 + $0x18] sm:$0xff]   ;;  %v933_v39 = vld [vmem:[#allocation10 + $0x10] sm:$0xff]  }
  0x55   :  { %798 = vmatpush3.bf16.msra.mxu0 %v906_v3  ;;  %818 = vmatpush3.bf16.msra.mxu1 %v914_v8  ;;  %v712_v40 = vld [vmem:[%s1270_s4] ss:$0 sm:$0xff]  ;;  %v934_v48 = vld [vmem:[#allocation10 + $0x8] sm:$0xff]   ;;  %v935_v49 = vld [vmem:[#allocation10] sm:$0xff]  }
  0x56   :  { %799 = vmatprep.subr.bf16.mxu0 %v1102_v0  ;;  %819 = vmatprep.subr.bf16.mxu1 %v1102_v0  ;;  %v936_v50 = vld [vmem:[#allocation11 + $0x38] sm:$0xff]   ;;  %v937_v51 = vld [vmem:[#allocation11 + $0x30] sm:$0xff]   ;;  %v938_v52 = vld [vmem:[#allocation11 + $0x28] sm:$0xff]  }
  0x57   :  { %v939_v53 = vld [vmem:[#allocation11 + $0x20] sm:$0xff]   ;;  %v940_v54 = vld [vmem:[#allocation11 + $0x18] sm:$0xff]   ;;  %v941_v55 = vld [vmem:[#allocation11 + $0x10] sm:$0xff]  }
  0x58   :  { %v721_v56 = vld [vmem:[%s1272_s6] ss:$0 sm:$0xff]  ;;  %v942_v1 = vld [vmem:[#allocation11 + $0x8] sm:$0xff]   ;;  %v943_v2 = vld [vmem:[#allocation11] sm:$0xff]  }
  0x59   :  { %800 = vmatpush3.bf16.msra.mxu0 %v907_v5  ;;  %820 = vmatpush3.bf16.msra.mxu1 %v915_v10  ;;  %v730_v3 = vld [vmem:[%s1274_s8] ss:$0 sm:$0xff]  ;;  %s1064_s8 = scalar_lea.vmem %s692_s12, 128 }
  0x5a   :  { %801 = vmatprep.subr.bf16.mxu0 %v1102_v0  ;;  %821 = vmatprep.subr.bf16.mxu1 %v1102_v0  ;;  %p1065_p2 = scmp.ne.s32.totalorder %s692_s12, %s1064_s8  ;;  %p1070_p4 = scmp.lt.s32.totalorder %s1064_s8, %s1064_s8 }
  0x5c   :  { %p1071_p5 = por %p1070_p4, %p1069_p3 }
  0x5d   :  { %802 = vmatpush3.bf16.msra.mxu0 %v908_v7  ;;  %822 = vmatpush3.bf16.msra.mxu1 %v916_v12 }
  0x5e   :  { %803 = vmatprep.subr.bf16.mxu0 %v1102_v0  ;;  %823 = vmatprep.subr.bf16.mxu1 %v1102_v0  ;;  %p1072_p6 = pnand %p1071_p5, %p1065_p2 }
  0x61   :  { %804 = vmatpush3.bf16.msra.mxu0 %v909_v9  ;;  %824 = vmatpush3.bf16.msra.mxu1 %v917_v14 }
  0x62   :  { %805 = vmatprep.subr.bf16.mxu0 %v1102_v0  ;;  %825 = vmatprep.subr.bf16.mxu1 %v1102_v0 }
  0x65   :  { %806 = vmatpush3.bf16.msra.mxu0 %v910_v11  ;;  %826 = vmatpush3.bf16.msra.mxu1 %v918_v16  ;;  %v739_v11 = vld [vmem:[%s1276_s10] ss:$0 sm:$0xff] }
  0x66   :  { %807 = vmatprep.subr.bf16.mxu0 %v1102_v0  ;;  %827 = vmatprep.subr.bf16.mxu1 %v1102_v0 }
  0x69   :  { %808 = vmatpush3.bf16.msra.mxu0 %v911_v13  ;;  %828 = vmatpush3.bf16.msra.mxu1 %v919_v17 }
  0x6a   :  { %833 = vmatprep.subr.bf16.mxu0 %v1102_v0  ;;  %853 = vmatprep.subr.bf16.mxu1 %v1102_v0 }
  0x6c   :  { %810 = vmatmul.mubr.bf16.vlgmr.msra.gmra.mxu0 %v120_v15 }
  0x6d   :  { %849 = vmatprep.mubr.msk.bf16.mxu0 %vm1103_vm0, %v1102_v0  ;;  %834 = vmatpush3.bf16.msra.mxu0 %v920_v18 }
  0x6e   :  { %835 = vmatprep.subr.bf16.mxu0 %v1102_v0 }
  0x71   :  { %836 = vmatpush3.bf16.msra.mxu0 %v921_v19 }
  0x72   :  { %837 = vmatprep.subr.bf16.mxu0 %v1102_v0 }
  0x75   :  { %838 = vmatpush3.bf16.msra.mxu0 %v922_v20 }
  0x76   :  { %839 = vmatprep.subr.bf16.mxu0 %v1102_v0 }
  0x79   :  { %840 = vmatpush3.bf16.msra.mxu0 %v923_v21 }
  0x7a   :  { %841 = vmatprep.subr.bf16.mxu0 %v1102_v0 }
  0x7d   :  { %842 = vmatpush3.bf16.msra.mxu0 %v924_v22 }
  0x7e   :  { %843 = vmatprep.subr.bf16.mxu0 %v1102_v0 }
  0x81   :  { %844 = vmatpush3.bf16.msra.mxu0 %v925_v23 }
  0x82   :  { %845 = vmatprep.subr.bf16.mxu0 %v1102_v0 }
  0x85   :  { %846 = vmatpush3.bf16.msra.mxu0 %v926_v32 }
  0x86   :  { %847 = vmatprep.subr.bf16.mxu0 %v1102_v0 }
  0x89   :  { %848 = vmatpush3.bf16.msra.mxu0 %v927_v33 }
  0x8a   :  { %873 = vmatprep.subr.bf16.mxu0 %v1102_v0 }
 0x12c   :  { %v226_v25 = vpop.f32.mrf.mxu0 }
 0x12d   :  { %v227_v26 = vadd.f32 %v703_v24, %v226_v25 }
 0x12e   :  { %v811_v27 = vpop.f32.mrf.mxu0 }
 0x12f   :  { %v232_v28 = vmax.f32 %v227_v26, 0.0 }
 0x130   :  { %v229_v29 = vpop.f32.mrf.mxu0 }
 0x131   :  { %v233_v30 = vpack.c.bf16 %v232_v28, %v232_v28 }
 0x132   :  { %v812_v31 = vpop.f32.mrf.mxu0 }
 0x133   :  { %830 = vmatmul.mubr.bf16.vlgmr.msra.gmra.mxu1 %v233_v30 }
 0x134   :  { %869 = vmatprep.mubr.msk.bf16.mxu1 %vm1103_vm0, %v1102_v0  ;;  %854 = vmatpush3.bf16.msra.mxu1 %v928_v34 }
 0x135   :  { %855 = vmatprep.subr.bf16.mxu1 %v1102_v0 }
 0x138   :  { %856 = vmatpush3.bf16.msra.mxu1 %v929_v35 }
 0x139   :  { %857 = vmatprep.subr.bf16.mxu1 %v1102_v0 }
 0x13c   :  { %858 = vmatpush3.bf16.msra.mxu1 %v930_v36 }
 0x13d   :  { %859 = vmatprep.subr.bf16.mxu1 %v1102_v0 }
 0x140   :  { %860 = vmatpush3.bf16.msra.mxu1 %v931_v37 }
 0x141   :  { %861 = vmatprep.subr.bf16.mxu1 %v1102_v0 }
 0x144   :  { %862 = vmatpush3.bf16.msra.mxu1 %v932_v38 }
 0x145   :  { %863 = vmatprep.subr.bf16.mxu1 %v1102_v0 }
 0x148   :  { %864 = vmatpush3.bf16.msra.mxu1 %v933_v39 }
 0x149   :  { %865 = vmatprep.subr.bf16.mxu1 %v1102_v0 }
 0x14c   :  { %866 = vmatpush3.bf16.msra.mxu1 %v934_v48 }
 0x14d   :  { %867 = vmatprep.subr.bf16.mxu1 %v1102_v0 }
 0x150   :  { %868 = vmatpush3.bf16.msra.mxu1 %v935_v49 }
 0x1f3   :  { %v339_v41 = vpop.f32.mrf.mxu1 }
 0x1f4   :  { %v340_v42 = vadd.f32 %v712_v40, %v339_v41 }
 0x1f5   :  { %v831_v43 = vpop.f32.mrf.mxu1 }
 0x1f6   :  { %v345_v44 = vmax.f32 %v340_v42, 0.0 }
 0x1f7   :  { %v342_v45 = vpop.f32.mrf.mxu1 }
 0x1f8   :  { %v346_v46 = vpack.c.bf16 %v345_v44, %v345_v44 }
 0x1f9   :  { %v832_v47 = vpop.f32.mrf.mxu1 }
 0x1fa   :  { %850 = vmatmul.mubr.bf16.vlgmr.msra.gmra.mxu0 %v346_v46 }
 0x1fb   :  { %889 = vmatprep.mubr.msk.bf16.mxu0 %vm1103_vm0, %v1102_v0  ;;  %874 = vmatpush3.bf16.msra.mxu0 %v936_v50 }
 0x1fc   :  { %875 = vmatprep.subr.bf16.mxu0 %v1102_v0 }
 0x1ff   :  { %876 = vmatpush3.bf16.msra.mxu0 %v937_v51 }
 0x200   :  { %877 = vmatprep.subr.bf16.mxu0 %v1102_v0 }
 0x203   :  { %878 = vmatpush3.bf16.msra.mxu0 %v938_v52 }
 0x204   :  { %879 = vmatprep.subr.bf16.mxu0 %v1102_v0 }
 0x207   :  { %880 = vmatpush3.bf16.msra.mxu0 %v939_v53 }
 0x208   :  { %881 = vmatprep.subr.bf16.mxu0 %v1102_v0 }
 0x20b   :  { %882 = vmatpush3.bf16.msra.mxu0 %v940_v54 }
 0x20c   :  { %883 = vmatprep.subr.bf16.mxu0 %v1102_v0 }
 0x20f   :  { %884 = vmatpush3.bf16.msra.mxu0 %v941_v55 }
 0x210   :  { %885 = vmatprep.subr.bf16.mxu0 %v1102_v0 }
 0x213   :  { %886 = vmatpush3.bf16.msra.mxu0 %v942_v1 }
 0x214   :  { %887 = vmatprep.subr.bf16.mxu0 %v1102_v0 }
 0x217   :  { %888 = vmatpush3.bf16.msra.mxu0 %v943_v2 }
 0x2ba   :  { %v452_v57 = vpop.f32.mrf.mxu0 }
 0x2bb   :  { %v453_v58 = vadd.f32 %v721_v56, %v452_v57 }
 0x2bc   :  { %v851_v59 = vpop.f32.mrf.mxu0 }
 0x2bd   :  { %v458_v60 = vmax.f32 %v453_v58, 0.0 }
 0x2be   :  { %v455_v61 = vpop.f32.mrf.mxu0 }
 0x2bf   :  { %v459_v62 = vpack.c.bf16 %v458_v60, %v458_v60 }
 0x2c0   :  { %v852_v63 = vpop.f32.mrf.mxu0 }
 0x2c1   :  { %870 = vmatmul.mubr.bf16.vlgmr.msra.gmra.mxu1 %v459_v62 }
 0x381   :  { %v565_v4 = vpop.f32.mrf.mxu1 }
 0x382   :  { %v566_v5 = vadd.f32 %v730_v3, %v565_v4 }
 0x383   :  { %v871_v6 = vpop.f32.mrf.mxu1 }
 0x384   :  { %v571_v7 = vmax.f32 %v566_v5, 0.0 }
 0x385   :  { %v568_v8 = vpop.f32.mrf.mxu1 }
 0x386   :  { %v572_v9 = vpack.c.bf16 %v571_v7, %v571_v7 }
 0x387   :  { %v872_v10 = vpop.f32.mrf.mxu1 }
 0x388   :  { %890 = vmatmul.mubr.bf16.vlgmr.msra.gmra.mxu0 %v572_v9 }
 0x448   :  { %v678_v0 = vpop.f32.mrf.mxu0 }
 0x449   :  { %v679_v12 = vadd.f32 %v739_v11, %v678_v0 }
 0x44a   :  { %v891_v13 = vpop.f32.mrf.mxu0 }
 0x44b   :  { %684 = vst [vmem:[#allocation13] sm:$0xff] %v679_v12 }
 0x44c   :  { %v681_v14 = vpop.f32.mrf.mxu0 }
 0x44d   :  { %1075 = shalt.err (!%p1072_p6)
}
 0x44e   :  { %694 = dma.vmem_to_hbm [thread:$0]  %s692_s12, 128, %s1277_s11, [#allocation4]   ;;  %v892_v15 = vpop.f32.mrf.mxu0 }
 0x44f   :  { %1092 = dma.done.wait [#allocation4], 128  }
 0x450   :  { %1093 = vsyncadd [#allocation4], 4294967168 }
 0x451   :  { %698 = vsyncpa [#allocation3], 1 }
 0x452   :  { %699 = vsyncpa [#allocation6], 1 }
 0x453   :  { %700 = vsyncpa [#allocation9], 1 }
 0x454   :  { %701 = vsyncpa [#allocation12], 1 }
 0x455   :  { %702 = vsyncpa [#allocation4], 1 }

</bundles_post_ra>
